<compile_context>
chip_gen: v7x
topology: tpu7x:2x2x1
jax: 0.10.0
libtpu: 0.0.40
codegen_flags: <defaults>
</compile_context>

<pallas_src>
import math
import jax
import jax.numpy as jnp
from jax.experimental import pallas as pl
from jax.experimental.pallas import tpu as pltpu


def _softmax_last(x):
    """Numerically-stable softmax over the last axis (f32 in/out)."""
    m = jnp.max(x, axis=-1, keepdims=True)
    e = jnp.exp(x - m)
    # Divide goes to the EUP via the approximate reciprocal (otherwise-idle slot).
    return e * pl.reciprocal(jnp.sum(e, axis=-1, keepdims=True), approx=True)


def cross_attention_kernel(a_ref, b_ref, wa_ref, ba_ref, wb_ref, bb_ref, out_ref):
    """One grid step = Bt batch elements.

    a_ref : [Bt, S, Da]      b_ref : [Bt, S, Db]
    wa_ref: [Da, 3H] fused (q|k|v) projection for stream a (scale folded into q)
    wb_ref: [Db, 3H] fused (q|k|v) projection for stream b (scale folded into q)
    ba_ref/bb_ref: [1, 3H] fused biases.
    """
    Bt, S, Da = a_ref.shape
    _, _, Db = b_ref.shape
    H = wa_ref.shape[1] // 3

    # ---- fused projections: 2 wide matmuls (N = 3H) instead of 6 skinny ones ----
    a2 = a_ref[...].reshape(Bt * S, Da)
    b2 = b_ref[...].reshape(Bt * S, Db)
    proj_a = jnp.dot(a2, wa_ref[...], preferred_element_type=jnp.float32) + ba_ref[...]
    proj_b = jnp.dot(b2, wb_ref[...], preferred_element_type=jnp.float32) + bb_ref[...]

    def split_qkv(p):
        q = p[:, 0 * H:1 * H].reshape(Bt, S, H).astype(jnp.bfloat16)
        k = p[:, 1 * H:2 * H].reshape(Bt, S, H).astype(jnp.bfloat16)
        v = p[:, 2 * H:3 * H].reshape(Bt, S, H).astype(jnp.bfloat16)
        return q, k, v

    q_a, k_a, v_a = split_qkv(proj_a)   # q_a already carries the 1/sqrt(H) scale
    q_b, k_b, v_b = split_qkv(proj_b)

    # ---- attention a -> b (bf16 operands, f32 MXU accumulation) ----
    s_a = jnp.einsum("bqh,bkh->bqk", q_a, k_b, preferred_element_type=jnp.float32)
    p_a = _softmax_last(s_a)
    o_a = jnp.einsum("bqk,bkh->bqh", p_a.astype(jnp.bfloat16), v_b,
                     preferred_element_type=jnp.float32)

    # ---- attention b -> a ----
    s_b = jnp.einsum("bqh,bkh->bqk", q_b, k_a, preferred_element_type=jnp.float32)
    p_b = _softmax_last(s_b)
    o_b = jnp.einsum("bqk,bkh->bqh", p_b.astype(jnp.bfloat16), v_a,
                     preferred_element_type=jnp.float32)

    out_ref[...] = (o_a + o_b).astype(out_ref.dtype)


def _pick_block_batch(B, S):
    # Batch several sequences per grid step so the projection matmuls see
    # Bt*S rows toward/above 128 (MXU sublane utilization, dense DMAs) while
    # keeping the per-step tile to a few hundred rows. Bt must divide B.
    cap = max(1, -(-512 // S))
    return max(d for d in range(1, B + 1) if B % d == 0 and d <= cap)


def fuse_params(params, hidden_dim):
    """Concatenate the six Linear layers into two [Din, 3H] matmuls.

    The 1/sqrt(H) attention scale is folded into the q columns (and q bias),
    removing the per-score scale multiply from the kernel entirely.
    """
    scale = 1.0 / math.sqrt(hidden_dim)
    wa = jnp.concatenate([params["wqa"] * scale, params["wka"], params["wva"]], axis=1)
    ba = jnp.concatenate([params["bqa"] * scale, params["bka"], params["bva"]], axis=1)
    wb = jnp.concatenate([params["wqb"] * scale, params["wkb"], params["wvb"]], axis=1)
    bb = jnp.concatenate([params["bqb"] * scale, params["bkb"], params["bvb"]], axis=1)
    return wa, ba, wb, bb


def cross_attention(input_a, input_b, params):
    """input_a: [B, S, Da], input_b: [B, S, Db] -> [B, S, H]."""
    B, S, Da = input_a.shape
    _, _, Db = input_b.shape
    H = params["wqa"].shape[1]
    wa, ba, wb, bb = fuse_params(params, H)

    Bt = _pick_block_batch(B, S)
    grid = (B // Bt,)

    # Fused weights/biases: whole-array, VMEM-resident (constant across the
    # grid) -> no double-buffered pipeline copies.
    w_spec = pl.BlockSpec(memory_space=pltpu.MemorySpace.VMEM)

    # TODO(synk): for large S (>~2K) replace the full [S, S] score materialization
    #             with a KV-tiled online-softmax loop and set vmem_limit_bytes
    #             explicitly (v7x 64 MiB VMEM, v5e 16 MiB scoped default).
    return pl.pallas_call(
        cross_attention_kernel,
        out_shape=jax.ShapeDtypeStruct((B, S, H), jnp.float32),
        grid=grid,
        in_specs=[
            pl.BlockSpec((Bt, S, Da), lambda i: (i, 0, 0)),
            pl.BlockSpec((Bt, S, Db), lambda i: (i, 0, 0)),
            w_spec, w_spec, w_spec, w_spec,
        ],
        out_specs=pl.BlockSpec((Bt, S, H), lambda i: (i, 0, 0)),
        compiler_params=pltpu.CompilerParams(
            dimension_semantics=("parallel",),
        ),
    )(input_a, input_b, wa, ba, wb, bb)


def init_params(key, input_dim_a, input_dim_b, hidden_dim):
    ks = jax.random.split(key, 12)

    def lin(kw, kb, din, dout):
        # Weights stored [in, out] (kernel computes x @ W + b).
        w = jax.random.normal(kw, (din, dout), jnp.float32) * (1.0 / math.sqrt(din))
        b = jax.random.normal(kb, (1, dout), jnp.float32) * 0.01
        return w, b

    wqa, bqa = lin(ks[0], ks[1], input_dim_a, hidden_dim)
    wkb, bkb = lin(ks[2], ks[3], input_dim_b, hidden_dim)
    wvb, bvb = lin(ks[4], ks[5], input_dim_b, hidden_dim)
    wqb, bqb = lin(ks[6], ks[7], input_dim_b, hidden_dim)
    wka, bka = lin(ks[8], ks[9], input_dim_a, hidden_dim)
    wva, bva = lin(ks[10], ks[11], input_dim_a, hidden_dim)
    return dict(wqa=wqa, bqa=bqa, wkb=wkb, bkb=bkb, wvb=wvb, bvb=bvb,
                wqb=wqb, bqb=bqb, wka=wka, bka=bka, wva=wva, bva=bva)


def cross_attention_ref(input_a, input_b, params):
    """Pure-JAX f32 reference for verification."""
    def proj(x, w, b):
        return x @ w + b

    q_a = proj(input_a, params["wqa"], params["bqa"])
    k_b = proj(input_b, params["wkb"], params["bkb"])
    v_b = proj(input_b, params["wvb"], params["bvb"])
    q_b = proj(input_b, params["wqb"], params["bqb"])
    k_a = proj(input_a, params["wka"], params["bka"])
    v_a = proj(input_a, params["wva"], params["bva"])
    scale = 1.0 / math.sqrt(q_a.shape[-1])
    attn_a = jax.nn.softmax(jnp.einsum("bsh,bth->bst", q_a, k_b) * scale, axis=-1)
    attn_b = jax.nn.softmax(jnp.einsum("bsh,bth->bst", q_b, k_a) * scale, axis=-1)
    out_a = jnp.einsum("bst,bth->bsh", attn_a, v_b)
    out_b = jnp.einsum("bst,bth->bsh", attn_b, v_a)
    return out_a + out_b


if __name__ == "__main__":
    B, S = 2, 8
    input_dim_a, input_dim_b, hidden_dim = 16, 32, 32

    key = jax.random.PRNGKey(0)
    k_a, k_b, k_p = jax.random.split(key, 3)
    input_a = jax.random.normal(k_a, (B, S, input_dim_a), jnp.float32)
    input_b = jax.random.normal(k_b, (B, S, input_dim_b), jnp.float32)
    params = init_params(k_p, input_dim_a, input_dim_b, hidden_dim)

    out = cross_attention(input_a, input_b, params)
    out = jax.block_until_ready(out)

    ref = cross_attention_ref(input_a, input_b, params)
    assert out.shape == (B, S, hidden_dim)
    # bf16 attention matmuls + approx reciprocal -> bf16-level tolerance.
    assert jnp.allclose(out, ref, atol=5e-2, rtol=5e-2), "mismatch vs reference"

    print("KERNEL_OK")
</pallas_src>

<mosaic_0001>
module attributes {stable_mosaic.version = 11 : i64} {
  func.func @cross_attention_kernel(%arg0: i32, %arg1: memref<2x8x16xf32, #tpu.memory_space<vmem>>, %arg2: memref<2x8x32xf32, #tpu.memory_space<vmem>>, %arg3: memref<16x96xf32, #tpu.memory_space<vmem>>, %arg4: memref<1x96xf32, #tpu.memory_space<vmem>>, %arg5: memref<32x96xf32, #tpu.memory_space<vmem>>, %arg6: memref<1x96xf32, #tpu.memory_space<vmem>>, %arg7: memref<2x8x32xf32, #tpu.memory_space<vmem>>) attributes {dimension_semantics = [#tpu.dimension_semantics<parallel>], iteration_bounds = array<i64: 1>, scalar_prefetch = 0 : i64, scratch_operands = 0 : i64, tpu.core_type = #tpu.core_type<tc>, window_params = [{transform_indices = @transform_0, window_bounds = array<i64: 2, 8, 16>}, {transform_indices = @transform_1, window_bounds = array<i64: 2, 8, 32>}, {pipeline_mode = #tpu.pipeline_mode<synchronous>, transform_indices = @transform_2, window_bounds = array<i64: 16, 96>}, {pipeline_mode = #tpu.pipeline_mode<synchronous>, transform_indices = @transform_3, window_bounds = array<i64: 1, 96>}, {pipeline_mode = #tpu.pipeline_mode<synchronous>, transform_indices = @transform_4, window_bounds = array<i64: 32, 96>}, {pipeline_mode = #tpu.pipeline_mode<synchronous>, transform_indices = @transform_5, window_bounds = array<i64: 1, 96>}, {transform_indices = @transform_6, window_bounds = array<i64: 2, 8, 32>}]} {
    %c0 = arith.constant 0 : index
    %c0_0 = arith.constant 0 : index
    %c0_1 = arith.constant 0 : index
    %0 = vector.load %arg1[%c0, %c0_0, %c0_1] : memref<2x8x16xf32, #tpu.memory_space<vmem>>, vector<2x8x16xf32>
    %1 = vector.shape_cast %0 : vector<2x8x16xf32> to vector<16x16xf32>
    %c0_2 = arith.constant 0 : index
    %c0_3 = arith.constant 0 : index
    %c0_4 = arith.constant 0 : index
    %2 = vector.load %arg2[%c0_2, %c0_3, %c0_4] : memref<2x8x32xf32, #tpu.memory_space<vmem>>, vector<2x8x32xf32>
    %3 = vector.shape_cast %2 : vector<2x8x32xf32> to vector<16x32xf32>
    %c0_5 = arith.constant 0 : index
    %c0_6 = arith.constant 0 : index
    %4 = vector.load %arg3[%c0_5, %c0_6] : memref<16x96xf32, #tpu.memory_space<vmem>>, vector<16x96xf32>
    %cst = arith.constant dense<0.000000e+00> : vector<16x96xf32>
    %5 = tpu.matmul %1, %4, %cst {dimension_numbers = #tpu.dot_dimension_numbers<[1], [0], [0], [1], [0, 0, 1, 1], [], []>} : vector<16x16xf32>, vector<16x96xf32>, vector<16x96xf32> -> vector<16x96xf32>
    %c0_7 = arith.constant 0 : index
    %c0_8 = arith.constant 0 : index
    %6 = vector.load %arg4[%c0_7, %c0_8] : memref<1x96xf32, #tpu.memory_space<vmem>>, vector<1x96xf32>
    %7 = vector.broadcast %6 : vector<1x96xf32> to vector<16x96xf32>
    %8 = arith.addf %5, %7 : vector<16x96xf32>
    %c0_9 = arith.constant 0 : index
    %c0_10 = arith.constant 0 : index
    %9 = vector.load %arg5[%c0_9, %c0_10] : memref<32x96xf32, #tpu.memory_space<vmem>>, vector<32x96xf32>
    %cst_11 = arith.constant dense<0.000000e+00> : vector<16x96xf32>
    %10 = tpu.matmul %3, %9, %cst_11 {dimension_numbers = #tpu.dot_dimension_numbers<[1], [0], [0], [1], [0, 0, 1, 1], [], []>} : vector<16x32xf32>, vector<32x96xf32>, vector<16x96xf32> -> vector<16x96xf32>
    %c0_12 = arith.constant 0 : index
    %c0_13 = arith.constant 0 : index
    %11 = vector.load %arg6[%c0_12, %c0_13] : memref<1x96xf32, #tpu.memory_space<vmem>>, vector<1x96xf32>
    %12 = vector.broadcast %11 : vector<1x96xf32> to vector<16x96xf32>
    %13 = arith.addf %10, %12 : vector<16x96xf32>
    %14 = vector.extract_strided_slice %8 {offsets = [0, 0], sizes = [16, 32], strides = [1, 1]} : vector<16x96xf32> to vector<16x32xf32>
    %15 = vector.shape_cast %14 : vector<16x32xf32> to vector<2x8x32xf32>
    %16 = arith.truncf %15 : vector<2x8x32xf32> to vector<2x8x32xbf16>
    %17 = vector.extract_strided_slice %8 {offsets = [0, 32], sizes = [16, 32], strides = [1, 1]} : vector<16x96xf32> to vector<16x32xf32>
    %18 = vector.shape_cast %17 : vector<16x32xf32> to vector<2x8x32xf32>
    %19 = arith.truncf %18 : vector<2x8x32xf32> to vector<2x8x32xbf16>
    %20 = vector.extract_strided_slice %8 {offsets = [0, 64], sizes = [16, 32], strides = [1, 1]} : vector<16x96xf32> to vector<16x32xf32>
    %21 = vector.shape_cast %20 : vector<16x32xf32> to vector<2x8x32xf32>
    %22 = arith.truncf %21 : vector<2x8x32xf32> to vector<2x8x32xbf16>
    %23 = vector.extract_strided_slice %13 {offsets = [0, 0], sizes = [16, 32], strides = [1, 1]} : vector<16x96xf32> to vector<16x32xf32>
    %24 = vector.shape_cast %23 : vector<16x32xf32> to vector<2x8x32xf32>
    %25 = arith.truncf %24 : vector<2x8x32xf32> to vector<2x8x32xbf16>
    %26 = vector.extract_strided_slice %13 {offsets = [0, 32], sizes = [16, 32], strides = [1, 1]} : vector<16x96xf32> to vector<16x32xf32>
    %27 = vector.shape_cast %26 : vector<16x32xf32> to vector<2x8x32xf32>
    %28 = arith.truncf %27 : vector<2x8x32xf32> to vector<2x8x32xbf16>
    %29 = vector.extract_strided_slice %13 {offsets = [0, 64], sizes = [16, 32], strides = [1, 1]} : vector<16x96xf32> to vector<16x32xf32>
    %30 = vector.shape_cast %29 : vector<16x32xf32> to vector<2x8x32xf32>
    %31 = arith.truncf %30 : vector<2x8x32xf32> to vector<2x8x32xbf16>
    "tpu.trace_start"() <{level = 10 : i32, message = "bqh,bkh->bqk"}> : () -> ()
    %cst_14 = arith.constant dense<0.000000e+00> : vector<2x8x8xf32>
    %32 = tpu.matmul %16, %28, %cst_14 {dimension_numbers = #tpu.dot_dimension_numbers<[2], [2], [1], [1], [0, 0, 0, 1, 1, 1], [0], [0]>} : vector<2x8x32xbf16>, vector<2x8x32xbf16>, vector<2x8x8xf32> -> vector<2x8x8xf32>
    "tpu.trace_stop"() : () -> ()
    %cst_15 = arith.constant dense<0xFF800000> : vector<2x8xf32>
    %33 = vector.multi_reduction <maximumf>, %32, %cst_15 [2] : vector<2x8x8xf32> to vector<2x8xf32>
    %34 = vector.shape_cast %33 : vector<2x8xf32> to vector<2x8x1xf32>
    %35 = vector.broadcast %34 : vector<2x8x1xf32> to vector<2x8x8xf32>
    %36 = arith.subf %32, %35 : vector<2x8x8xf32>
    %37 = math.exp %36 : vector<2x8x8xf32>
    %cst_16 = arith.constant dense<0.000000e+00> : vector<2x8xf32>
    %38 = vector.multi_reduction <add>, %37, %cst_16 [2] : vector<2x8x8xf32> to vector<2x8xf32>
    %39 = vector.shape_cast %38 : vector<2x8xf32> to vector<2x8x1xf32>
    %40 = tpu.reciprocal %39 {approx = true} : vector<2x8x1xf32> -> vector<2x8x1xf32>
    %41 = vector.broadcast %40 : vector<2x8x1xf32> to vector<2x8x8xf32>
    %42 = arith.mulf %37, %41 : vector<2x8x8xf32>
    %43 = arith.truncf %42 : vector<2x8x8xf32> to vector<2x8x8xbf16>
    "tpu.trace_start"() <{level = 10 : i32, message = "bqk,bkh->bqh"}> : () -> ()
    %cst_17 = arith.constant dense<0.000000e+00> : vector<2x8x32xf32>
    %44 = tpu.matmul %43, %31, %cst_17 {dimension_numbers = #tpu.dot_dimension_numbers<[2], [1], [1], [2], [0, 0, 0, 1, 1, 2], [0], [0]>} : vector<2x8x8xbf16>, vector<2x8x32xbf16>, vector<2x8x32xf32> -> vector<2x8x32xf32>
    "tpu.trace_stop"() : () -> ()
    "tpu.trace_start"() <{level = 10 : i32, message = "bqh,bkh->bqk"}> : () -> ()
    %cst_18 = arith.constant dense<0.000000e+00> : vector<2x8x8xf32>
    %45 = tpu.matmul %25, %19, %cst_18 {dimension_numbers = #tpu.dot_dimension_numbers<[2], [2], [1], [1], [0, 0, 0, 1, 1, 1], [0], [0]>} : vector<2x8x32xbf16>, vector<2x8x32xbf16>, vector<2x8x8xf32> -> vector<2x8x8xf32>
    "tpu.trace_stop"() : () -> ()
    %cst_19 = arith.constant dense<0xFF800000> : vector<2x8xf32>
    %46 = vector.multi_reduction <maximumf>, %45, %cst_19 [2] : vector<2x8x8xf32> to vector<2x8xf32>
    %47 = vector.shape_cast %46 : vector<2x8xf32> to vector<2x8x1xf32>
    %48 = vector.broadcast %47 : vector<2x8x1xf32> to vector<2x8x8xf32>
    %49 = arith.subf %45, %48 : vector<2x8x8xf32>
    %50 = math.exp %49 : vector<2x8x8xf32>
    %cst_20 = arith.constant dense<0.000000e+00> : vector<2x8xf32>
    %51 = vector.multi_reduction <add>, %50, %cst_20 [2] : vector<2x8x8xf32> to vector<2x8xf32>
    %52 = vector.shape_cast %51 : vector<2x8xf32> to vector<2x8x1xf32>
    %53 = tpu.reciprocal %52 {approx = true} : vector<2x8x1xf32> -> vector<2x8x1xf32>
    %54 = vector.broadcast %53 : vector<2x8x1xf32> to vector<2x8x8xf32>
    %55 = arith.mulf %50, %54 : vector<2x8x8xf32>
    %56 = arith.truncf %55 : vector<2x8x8xf32> to vector<2x8x8xbf16>
    "tpu.trace_start"() <{level = 10 : i32, message = "bqk,bkh->bqh"}> : () -> ()
    %cst_21 = arith.constant dense<0.000000e+00> : vector<2x8x32xf32>
    %57 = tpu.matmul %56, %22, %cst_21 {dimension_numbers = #tpu.dot_dimension_numbers<[2], [1], [1], [2], [0, 0, 0, 1, 1, 2], [0], [0]>} : vector<2x8x8xbf16>, vector<2x8x32xbf16>, vector<2x8x32xf32> -> vector<2x8x32xf32>
    "tpu.trace_stop"() : () -> ()
    %58 = arith.addf %44, %57 : vector<2x8x32xf32>
    %c0_22 = arith.constant 0 : index
    %c0_23 = arith.constant 0 : index
    %c0_24 = arith.constant 0 : index
    %59 = vector.load %arg7[%c0_22, %c0_23, %c0_24] : memref<2x8x32xf32, #tpu.memory_space<vmem>>, vector<2x8x32xf32>
    tpu.vector_store %arg7[%c0_22, %c0_23, %c0_24], %58 {strides = array<i32>} : memref<2x8x32xf32, #tpu.memory_space<vmem>>, vector<2x8x32xf32>,
    return
  }
  func.func @transform_0(%arg0: i32) -> (i32, i32, i32) {
    %c0_i32 = arith.constant 0 : i32
    %c0_i32_0 = arith.constant 0 : i32
    %c0_i32_1 = arith.constant 0 : i32
    return %arg0, %c0_i32, %c0_i32_0 : i32, i32, i32
  }
  func.func @transform_1(%arg0: i32) -> (i32, i32, i32) {
    %c0_i32 = arith.constant 0 : i32
    %c0_i32_0 = arith.constant 0 : i32
    %c0_i32_1 = arith.constant 0 : i32
    return %arg0, %c0_i32, %c0_i32_0 : i32, i32, i32
  }
  func.func @transform_2(%arg0: i32) -> (i32, i32) {
    %c0_i32 = arith.constant 0 : i32
    %c0_i32_0 = arith.constant 0 : i32
    %c0_i32_1 = arith.constant 0 : i32
    return %c0_i32, %c0_i32_0 : i32, i32
  }
  func.func @transform_3(%arg0: i32) -> (i32, i32) {
    %c0_i32 = arith.constant 0 : i32
    %c0_i32_0 = arith.constant 0 : i32
    %c0_i32_1 = arith.constant 0 : i32
    return %c0_i32, %c0_i32_0 : i32, i32
  }
  func.func @transform_4(%arg0: i32) -> (i32, i32) {
    %c0_i32 = arith.constant 0 : i32
    %c0_i32_0 = arith.constant 0 : i32
    %c0_i32_1 = arith.constant 0 : i32
    return %c0_i32, %c0_i32_0 : i32, i32
  }
  func.func @transform_5(%arg0: i32) -> (i32, i32) {
    %c0_i32 = arith.constant 0 : i32
    %c0_i32_0 = arith.constant 0 : i32
    %c0_i32_1 = arith.constant 0 : i32
    return %c0_i32, %c0_i32_0 : i32, i32
  }
  func.func @transform_6(%arg0: i32) -> (i32, i32, i32) {
    %c0_i32 = arith.constant 0 : i32
    %c0_i32_0 = arith.constant 0 : i32
    %c0_i32_1 = arith.constant 0 : i32
    return %arg0, %c0_i32, %c0_i32_0 : i32, i32, i32
  }
}

</mosaic_0001>

<bundles_post_ra>
// kernel: tpu_custom_call.1
= control target key start
LH: loop header
LB: loop body
LE: loop exit
PB: predicated region body
PF: predicated region fallthrough
CT: control target
= control target key end

     0   :  { %11 = vsyncpa [#allocation3], 0  ;;  %s1214_s0 = inlined_call_operand.hbm [shape: f32[2,8,16], index: 0, kind: input, shape index: {}]   ;;  %s1215_s1 = inlined_call_operand.hbm [shape: f32[2,8,32], index: 1, kind: input, shape index: {}]   ;;  %s1216_s2 = inlined_call_operand.hbm [shape: f32[16,96], index: 2, kind: input, shape index: {}]   ;;  %s1217_s3 = inlined_call_operand.vmem [shape: f32[1,96], index: 3, kind: input, shape index: {}]   ;;  %s1218_s4 = inlined_call_operand.hbm [shape: f32[32,96], index: 4, kind: input, shape index: {}]   ;;  %s1219_s5 = inlined_call_operand.vmem [shape: f32[1,96], index: 5, kind: input, shape index: {}]   ;;  %s1220_s6 = inlined_call_operand.hbm [shape: f32[2,8,32], index: 6, kind: output, shape index: {}]  }
   0x1   :  { %12 = vsyncpa [#allocation6], 0 }
   0x2   :  { %13 = vsyncpa [#allocation9], 0 }
   0x3   :  { %14 = vsyncpa [#allocation4], 0  ;;  %s1002_s21 = smov [#allocation5]   ;;  %s1003_s23 = smov [#allocation2]  }
   0x4   :  { %s32_s22 = sshll.u32 %s1002_s21, 4  ;;  %s20_s24 = sshll.u32 %s1003_s23, 4  ;;  %s33_s22 = int_to_ptr.vmem [resolvable:$true] %s32_s22  ;;  %s1048_s24 = int_to_ptr.vmem [resolvable:$true] %s20_s24 }
   0x5   :  { %s884_s27 = scalar_lea.hbm %s1215_s1, 256 }
   0x6   :  { %p885_p0 = scmp.ne.s32.totalorder %s1215_s1, %s884_s27  ;;  %p888_p1 = scmp.lt.u32.totalorder %s884_s27, %s1215_s1 }
   0x8   :  { %p890_p2 = pnand %p888_p1, %p885_p0 }
   0xa   :  { %893 = shalt.err (!%p890_p2)
}
   0xb   :  { %s894_s8 = scalar_lea.vmem %s33_s22, 256  ;;  %p899_p4 = scmp.lt.s32.totalorder %s33_s22, %s33_s22 }
   0xc   :  { %p895_p3 = scmp.ne.s32.totalorder %s33_s22, %s894_s8  ;;  %p900_p5 = scmp.lt.s32.totalorder %s894_s8, %s894_s8 }
   0xe   :  { %p901_p6 = por %p900_p5, %p899_p4 }
  0x10   :  { %p902_p7 = pnand %p901_p6, %p895_p3 }
  0x12   :  { %905 = shalt.err (!%p902_p7)
}
  0x13   :  { %s1004_s9 = smov 128   ;;  %s1005_s10 = smov 8  }
  0x14   :  { %38 = dma.hbm_to_vmem [thread:$0]  %s1215_s1, 256, %s33_s22, [#allocation6], %s1004_s9, %s1004_s9, %s1005_s10  }
  0x15   :  { %s906_s15 = scalar_lea.hbm %s1214_s0, 256 }
  0x16   :  { %p907_p8 = scmp.ne.s32.totalorder %s1214_s0, %s906_s15  ;;  %p910_p9 = scmp.lt.u32.totalorder %s906_s15, %s1214_s0 }
  0x18   :  { %p912_p10 = pnand %p910_p9, %p907_p8 }
  0x1a   :  { %915 = shalt.err (!%p912_p10)
}
  0x1b   :  { %s916_s20 = scalar_lea.vmem %s1048_s24, 256  ;;  %p921_p12 = scmp.lt.s32.totalorder %s1048_s24, %s1048_s24 }
  0x1c   :  { %p917_p11 = scmp.ne.s32.totalorder %s1048_s24, %s916_s20  ;;  %p922_p13 = scmp.lt.s32.totalorder %s916_s20, %s916_s20 }
  0x1e   :  { %p923_p0 = por %p922_p13, %p921_p12 }
  0x20   :  { %p924_p1 = pnand %p923_p0, %p917_p11 }
  0x22   :  { %927 = shalt.err (!%p924_p1)
}
  0x23   :  { %26 = dma.hbm_to_vmem [thread:$0]  %s1214_s0, 256, %s1048_s24, [#allocation3], %s1004_s9, %s1004_s9, %s1005_s10  }
  0x24   :  { %s1006_s22 = smov [#allocation7]   ;;  %s1007_s25 = smov [#allocation8]  }
  0x25   :  { %s44_s23 = sshll.u32 %s1006_s22, 4  ;;  %s58_s26 = sshll.u32 %s1007_s25, 4  ;;  %s45_s23 = int_to_ptr.vmem [resolvable:$true] %s44_s23  ;;  %s1085_s26 = int_to_ptr.vmem [resolvable:$true] %s58_s26 }
  0x26   :  { %s928_s29 = scalar_lea.hbm %s1216_s2, 256 }
  0x27   :  { %p929_p2 = scmp.ne.s32.totalorder %s1216_s2, %s928_s29  ;;  %p932_p3 = scmp.lt.u32.totalorder %s928_s29, %s1216_s2 }
  0x29   :  { %p934_p4 = pnand %p932_p3, %p929_p2 }
  0x2b   :  { %937 = shalt.err (!%p934_p4)
}
  0x2c   :  { %s938_s0 = scalar_lea.vmem %s45_s23, 256  ;;  %p943_p6 = scmp.lt.s32.totalorder %s45_s23, %s45_s23 }
  0x2d   :  { %p939_p5 = scmp.ne.s32.totalorder %s45_s23, %s938_s0  ;;  %p944_p7 = scmp.lt.s32.totalorder %s938_s0, %s938_s0 }
  0x2f   :  { %p945_p8 = por %p944_p7, %p943_p6 }
  0x31   :  { %p946_p9 = pnand %p945_p8, %p939_p5 }
  0x33   :  { %949 = shalt.err (!%p946_p9)
}
  0x34   :  { %50 = dma.hbm_to_vmem [thread:$0]  %s1216_s2, 256, %s45_s23, [#allocation6], %s1004_s9, %s1004_s9, %s1005_s10  }
  0x35   :  { %s950_s15 = scalar_lea.hbm %s1218_s4, 512 }
  0x36   :  { %p951_p10 = scmp.ne.s32.totalorder %s1218_s4, %s950_s15  ;;  %p954_p11 = scmp.lt.u32.totalorder %s950_s15, %s1218_s4 }
  0x38   :  { %p956_p12 = pnand %p954_p11, %p951_p10 }
  0x3a   :  { %959 = shalt.err (!%p956_p12)
}
  0x3b   :  { %s960_s20 = scalar_lea.vmem %s1085_s26, 512  ;;  %p965_p0 = scmp.lt.s32.totalorder %s1085_s26, %s1085_s26 }
  0x3c   :  { %p961_p13 = scmp.ne.s32.totalorder %s1085_s26, %s960_s20  ;;  %p966_p1 = scmp.lt.s32.totalorder %s960_s20, %s960_s20 }
  0x3e   :  { %p967_p2 = por %p966_p1, %p965_p0 }
  0x40   :  { %p968_p3 = pnand %p967_p2, %p961_p13 }
  0x42   :  { %971 = shalt.err (!%p968_p3)
}
  0x43   :  { %64 = dma.hbm_to_vmem [thread:$0]  %s1218_s4, 512, %s1085_s26, [#allocation9], %s1004_s9, %s1004_s9, %s1005_s10  }
  0x44   :  { %994 = dma.done.wait [#allocation3], 256  }
  0x45   :  { %995 = vsyncadd [#allocation3], 4294967040 }
  0x46   :  { %996 = dma.done.wait [#allocation6], 512  }
  0x47   :  { %997 = vsyncadd [#allocation6], 4294966784 }
  0x48   :  { %998 = dma.done.wait [#allocation9], 512  }
  0x49   :  { %999 = vsyncadd [#allocation9], 4294966784  ;;  %v175_v0 = vld [vmem:[#allocation8] sm:$0xff]  ;;  %v176_v1 = vld [vmem:[#allocation8 + $0x8] sm:$0xff]  ;;  %vm186_vm0 = vcmask 261120   ;;  %vm93_vm1 = vcmask 130048  }
  0x4a   :  { %v177_v2 = vld [vmem:[#allocation8 + $0x10] sm:$0xff]  ;;  %v841_v3 = vpack.c.bf16 %v176_v1, %v175_v0  ;;  %v178_v4 = vld [vmem:[#allocation8 + $0x18] sm:$0xff]  ;;  %v82_v9 = vld [vmem:[#allocation5] sm:$0xff]  ;;  %v1008_v13 = vmov 0.0   ;;  %vm1009_vm2 = vmmov 0   ;;  %vm370_vm3 = vcmask 64512  }
  0x4b   :  { %v84_v5 = vld [vmem:[#allocation7] sm:$0xff]  ;;  %v85_v6 = vld [vmem:[#allocation7 + $0x8] sm:$0xff]  ;;  %v845_v7 = vpack.c.bf16 %v178_v4, %v177_v2  ;;  %786 = vmatprep.mubr.msk.f32.mxu1 %vm186_vm0, %v82_v9  ;;  %v83_v12 = vld [vmem:[#allocation5 + $0x8] sm:$0xff]  ;;  %vm522_vm4 = vcmask 1043456   ;;  %s1012_s25 = smov [#allocation10]  }
  0x4c   :  { %v837_v8 = vpack.c.bf16 %v85_v6, %v84_v5  ;;  %842 = vmatprep.subr.bf16.mxu1 %v841_v3  ;;  %v80_v10 = vld [vmem:[#allocation2] sm:$0xff]  ;;  %v81_v11 = vld [vmem:[#allocation2 + $0x8] sm:$0xff]  ;;  %s717_s26 = sshll.u32 %s1012_s25, 4  ;;  %s718_s26 = int_to_ptr.vmem [resolvable:$true] %s717_s26 }
  0x4d   :  { %844 = vmatpush3.bf16.msra.mxu1 %v841_v3  ;;  %775 = vmatprep.mubr.msk.f32.mxu0 %vm93_vm1, %v80_v10  ;;  %v731_v14 = vld [vmem:[%s1217_s3] ss:$0 sm:$0xff]  ;;  %s1010_s3 = smov 96   ;;  %s972_s27 = scalar_lea.vmem %s718_s26, 256 }
  0x4e   :  { %838 = vmatprep.subr.bf16.mxu0 %v837_v8  ;;  %846 = vmatprep.subr.bf16.mxu1 %v845_v7  ;;  %v734_v17 = vld [vmem:[%s1219_s5] ss:$0 sm:$0xff]  ;;  %s1011_s5 = smov 64   ;;  %p973_p4 = scmp.ne.s32.totalorder %s718_s26, %s972_s27 }
  0x4f   :  { %840 = vmatpush3.bf16.msra.mxu0 %v837_v8  ;;  %p977_p5 = scmp.lt.s32.totalorder %s718_s26, %s718_s26  ;;  %p978_p6 = scmp.lt.s32.totalorder %s972_s27, %s972_s27 }
  0x50   :  { %789 = vmatprep.subr.bf16.mxu0 %v1008_v13 }
  0x51   :  { %848 = vmatpush3.bf16.msra.mxu1 %v845_v7  ;;  %p979_p7 = por %p978_p6, %p977_p5 }
  0x52   :  { %776 = vmatmul.mubr.msk.f32.vlgmr.msra.gmra.mrb[0].mxu0 %vm93_vm1, %v81_v11  ;;  %795 = vmatprep.subr.bf16.mxu1 %v1008_v13 }
  0x53   :  { %791 = vmatprep.mubr.msk.bf16.mxu0 %vm1009_vm2, %v1008_v13  ;;  %p980_p8 = pnand %p979_p7, %p973_p4 }
  0x54   :  { %787 = vmatmul.mubr.msk.f32.vlgmr.msra.gmra.mrb[0].mxu1 %vm186_vm0, %v83_v12 }
  0x55   :  { %797 = vmatprep.mubr.msk.bf16.mxu1 %vm1009_vm2, %v1008_v13 }
 0x125   :  { %v777_v15 = vpop.f32.mrb[0].mxu0 }
 0x126   :  { %v166_v16 = vpop.f32.mrb[1].mxu0  ;;  %v172_v18 = vadd.f32 %v777_v15, %v731_v14 }
 0x127   :  { %v167_v19 = vadd.f32 %v731_v14, %v166_v16  ;;  %v788_v20 = vpop.f32.mrb[0].mxu1 }
 0x128   :  { %v259_v21 = vpop.f32.mrb[1].mxu1  ;;  %v1136_v24 = vpack.c.bf16 %v172_v18, %v172_v18  ;;  %v265_v25 = vadd.f32 %v788_v20, %v734_v17 }
 0x129   :  { %v268_v22 = vpack.c.bf16 %v167_v19, %v167_v19  ;;  %v260_v23 = vadd.f32 %v734_v17, %v259_v21 }
 0x12a   :  { %v1142_v27 = vpack.c.bf16 %v265_v25, %v265_v25 }
 0x12b   :  { %396 = vrot.lane.b32.xlu1 %v268_v22, %s1010_s3  ;;  %v1138_v26 = vpack.c.bf16 %v260_v23, %v260_v23 }
 0x12d   :  { %273 = vrot.lane.b32.xlu0 %v1138_v26, %s1010_s3 }
 0x12f   :  { %445 = vrot.lane.b32.xlu1 %v1136_v24, %s1010_s3 }
 0x131   :  { %322 = vrot.lane.b32.xlu0 %v1142_v27, %s1010_s3 }
 0x19d   :  { %v397_v30 = vpop.permute.xlu1 %396 }
 0x19e   :  { %v402_v33 = vsel %vm186_vm0, %v397_v30, 0 }
 0x19f   :  { %v274_v28 = vpop.permute.xlu0 %273 }
 0x1a0   :  { %v279_v29 = vsel %vm186_vm0, %v274_v28, 0 }
 0x1a1   :  { %790 = vmatpush3.bf16.xpose.msra.mxu0 %v279_v29  ;;  %v446_v34 = vpop.permute.xlu1 %445 }
 0x1a2   :  { %801 = vmatprep.subr.bf16.mxu0 %v1008_v13  ;;  %v451_v35 = vsel %vm186_vm0, %v446_v34, 0 }
 0x1a3   :  { %v323_v31 = vpop.permute.xlu0 %322 }
 0x1a4   :  { %v328_v32 = vsel %vm186_vm0, %v323_v31, 0 }
 0x1a5   :  { %796 = vmatpush3.bf16.xpose.msra.mxu1 %v328_v32 }
 0x1a6   :  { %807 = vmatprep.subr.bf16.mxu1 %v1008_v13 }
 0x1a8   :  { %792 = vmatmul.mubr.msk.bf16.vlgmr.msra.gmra.mrb[4].mxu0 %vm186_vm0, %v268_v22 }
 0x1a9   :  { %802 = vmatpush3.bf16.xpose.msra.mxu0 %v402_v33  ;;  %803 = vmatprep.mubr.msk.bf16.mxu0 %vm1009_vm2, %v1008_v13 }
 0x1aa   :  { %813 = vmatprep.subr.bf16.mxu0 %v1008_v13 }
 0x1ac   :  { %798 = vmatmul.mubr.msk.bf16.vlgmr.msra.gmra.mrb[4].mxu1 %vm186_vm0, %v1136_v24 }
 0x1ad   :  { %808 = vmatpush3.bf16.xpose.msra.mxu1 %v451_v35  ;;  %809 = vmatprep.mubr.msk.bf16.mxu1 %vm1009_vm2, %v1008_v13 }
 0x1ae   :  { %819 = vmatprep.subr.bf16.mxu1 %v1008_v13 }
 0x1b0   :  { %804 = vmatmul.mubr.msk.bf16.vlgmr.msra.gmra.mrb[8].mxu0 %vm186_vm0, %v1138_v26 }
 0x1b1   :  { %815 = vmatprep.mubr.msk.bf16.mxu0 %vm1009_vm2, %v1008_v13 }
 0x1b4   :  { %810 = vmatmul.mubr.msk.bf16.vlgmr.msra.gmra.mrb[8].mxu1 %vm186_vm0, %v1142_v27 }
 0x1b5   :  { %821 = vmatprep.mubr.msk.bf16.mxu1 %vm1009_vm2, %v1008_v13 }
 0x27b   :  { %v315_v36 = vpop.f32.mrb[4].mxu0 }
 0x27c   :  { %v793_v37 = vpop.f32.mrb[5].mxu0  ;;  %v371_v52 = vsel %vm370_vm3, %v315_v36, -inf }
 0x27d   :  { %v318_v38 = vpop.f32.mrb[6].mxu0 }
 0x27e   :  { %v794_v39 = vpop.f32.mrb[7].mxu0 }
 0x27f   :  { %v364_v40 = vpop.f32.mrb[4].mxu1 }
 0x280   :  { %v799_v41 = vpop.f32.mrb[5].mxu1  ;;  %v374_v55 = vsel %vm370_vm3, %v364_v40, -inf }
 0x281   :  { %v367_v42 = vpop.f32.mrb[6].mxu1 }
 0x282   :  { %v800_v43 = vpop.f32.mrb[7].mxu1 }
 0x283   :  { %v438_v44 = vpop.f32.mrb[8].mxu0 }
 0x284   :  { %v805_v45 = vpop.f32.mrb[9].mxu0  ;;  %v493_v46 = vsel %vm370_vm3, %v438_v44, -inf }
 0x285   :  { %494 = vmax.xlane.f32.xlu0 %v493_v46  ;;  %v441_v47 = vpop.f32.mrb[10].mxu0 }
 0x286   :  { %v806_v48 = vpop.f32.mrb[11].mxu0 }
 0x287   :  { %v487_v49 = vpop.f32.mrb[8].mxu1 }
 0x288   :  { %v811_v50 = vpop.f32.mrb[9].mxu1  ;;  %v496_v51 = vsel %vm370_vm3, %v487_v49, -inf }
 0x289   :  { %497 = vmax.xlane.f32.xlu1 %v496_v51  ;;  %v490_v53 = vpop.f32.mrb[10].mxu1  ;;  %372 = vmax.xlane.f32.xlu0 %v371_v52 }
 0x28a   :  { %v812_v54 = vpop.f32.mrb[11].mxu1 }
 0x28d   :  { %375 = vmax.xlane.f32.xlu0 %v374_v55 }
 0x29a   :  { %517 = vrot.lane.b32.xlu1 %v268_v22, %s1011_s5 }
 0x312   :  { %v495_v56 = vpop.xlane.xlu0 %494 }
 0x313   :  { %v499_v57 = vsub.f32 %v438_v44, %v495_v56 }
 0x315   :  { %v501_v63 = vmul.f32 1.442695, %v499_v57 }
 0x316   :  { %v498_v58 = vpop.xlane.xlu1 %497  ;;  %v373_v59 = vpop.xlane.xlu0 %372 }
 0x317   :  { %v377_v60 = vsub.f32 %v315_v36, %v373_v59  ;;  %v500_v61 = vsub.f32 %v487_v49, %v498_v58 }
 0x319   :  { %v379_v62 = vmul.f32 1.442695, %v377_v60  ;;  %v503_v4 = vmul.f32 1.442695, %v500_v61 }
 0x31a   :  { %v518_v0 = vpop.permute.xlu1 %517  ;;  %v376_v1 = vpop.xlane.xlu0 %375 }
 0x31b   :  { %v524_v2 = vsel %vm522_vm4, %v518_v0, 0  ;;  %v378_v3 = vsub.f32 %v364_v40, %v376_v1  ;;  %868 = vpow2.f32 %v379_v62 }
 0x31c   :  { %814 = vmatpush3.bf16.msra.mxu0 %v524_v2  ;;  %870 = vpow2.f32 %v501_v63 }
 0x31d   :  { %v381_v5 = vmul.f32 1.442695, %v378_v3  ;;  %825 = vmatprep.subr.bf16.mxu0 %v1008_v13 }
 0x31f   :  { %872 = vpow2.f32 %v381_v5 }
 0x320   :  { %874 = vpow2.f32 %v503_v4 }
 0x325   :  { %v869_v6 = vpop.eup %868 }
 0x326   :  { %v383_v7 = vsel %vm370_vm3, %v869_v6, 0.0  ;;  %v871_v8 = vpop.eup %870 }
 0x327   :  { %384 = vadd.xlane.f32.xlu1 %v383_v7  ;;  %v505_v12 = vsel %vm370_vm3, %v871_v8, 0.0 }
 0x329   :  { %v873_v9 = vpop.eup %872 }
 0x32a   :  { %v386_v10 = vsel %vm370_vm3, %v873_v9, 0.0  ;;  %v875_v11 = vpop.eup %874 }
 0x32b   :  { %387 = vadd.xlane.f32.xlu0 %v386_v10  ;;  %506 = vadd.xlane.f32.xlu1 %v505_v12  ;;  %v508_v14 = vsel %vm370_vm3, %v875_v11, 0.0 }
 0x32f   :  { %509 = vadd.xlane.f32.xlu0 %v508_v14 }
 0x33c   :  { %614 = vrot.lane.b32.xlu1 %v1138_v26, %s1011_s5 }
 0x340   :  { %662 = vrot.lane.b32.xlu1 %v1142_v27, %s1011_s5 }
 0x345   :  { %566 = vrot.lane.b32.xlu0 %v1136_v24, %s1011_s5 }
 0x3b4   :  { %v385_v15 = vpop.xlane.xlu1 %384 }
 0x3b8   :  { %v388_v16 = vpop.xlane.xlu0 %387  ;;  %v507_v17 = vpop.xlane.xlu1 %506 }
 0x3b9   :  { %876 = vrcp.f32 %v507_v17 }
 0x3bc   :  { %v510_v18 = vpop.xlane.xlu0 %509  ;;  %v615_v21 = vpop.permute.xlu1 %614 }
 0x3bd   :  { %878 = vrcp.f32 %v510_v18  ;;  %v620_v27 = vsel %vm522_vm4, %v615_v21, 0 }
 0x3be   :  { %880 = vrcp.f32 %v385_v15 }
 0x3bf   :  { %882 = vrcp.f32 %v388_v16 }
 0x3c0   :  { %v567_v19 = vpop.permute.xlu0 %566  ;;  %v663_v28 = vpop.permute.xlu1 %662 }
 0x3c1   :  { %v572_v20 = vsel %vm522_vm4, %v567_v19, 0  ;;  %v668_v31 = vsel %vm522_vm4, %v663_v28, 0 }
 0x3c2   :  { %820 = vmatpush3.bf16.msra.mxu1 %v572_v20 }
 0x3c3   :  { %831 = vmatprep.subr.bf16.mxu1 %v1008_v13  ;;  %v877_v22 = vpop.eup %876 }
 0x3c4   :  { %v513_v23 = vmul.f32 %v877_v22, %v871_v8 }
 0x3c6   :  { %v515_v26 = vpack.c.bf16 %v513_v23, %v513_v23 }
 0x3c7   :  { %v879_v25 = vpop.eup %878 }
 0x3c8   :  { %v514_v24 = vmul.f32 %v879_v25, %v875_v11  ;;  %816 = vmatmul.mubr.msk.bf16.vlgmr.msra.gmra.mrb[12].mxu0 %vm370_vm3, %v515_v26  ;;  %v881_v30 = vpop.eup %880 }
 0x3c9   :  { %826 = vmatpush3.bf16.msra.mxu0 %v620_v27  ;;  %827 = vmatprep.mubr.msk.bf16.mxu0 %vm1009_vm2, %v1008_v13  ;;  %v883_v32 = vpop.eup %882  ;;  %v391_v33 = vmul.f32 %v881_v30, %v869_v6 }
 0x3ca   :  { %v516_v29 = vpack.c.bf16 %v514_v24, %v514_v24  ;;  %v392_v34 = vmul.f32 %v883_v32, %v873_v9 }
 0x3cb   :  { %v393_v35 = vpack.c.bf16 %v391_v33, %v391_v33 }
 0x3cc   :  { %822 = vmatmul.mubr.msk.bf16.vlgmr.msra.gmra.mrb[12].mxu1 %vm370_vm3, %v516_v29  ;;  %v394_v36 = vpack.c.bf16 %v392_v34, %v392_v34 }
 0x3cd   :  { %832 = vmatpush3.bf16.msra.mxu1 %v668_v31  ;;  %833 = vmatprep.mubr.msk.bf16.mxu1 %vm1009_vm2, %v1008_v13 }
 0x3d4   :  { %828 = vmatmul.mubr.msk.bf16.vlgmr.msra.gmra.mrb[12].mxu0 %vm370_vm3, %v393_v35 }
 0x3d8   :  { %834 = vmatmul.mubr.msk.bf16.vlgmr.msra.gmra.mrb[12].mxu1 %vm370_vm3, %v394_v36 }
 0x4a7   :  { %v656_v37 = vpop.f32.mrb[12].mxu0 }
 0x4a8   :  { %710 = vst.msk [vmem:[#allocation10] sm:$0xff] %vm186_vm0, %v656_v37  ;;  %v829_v38 = vpop.f32.mrb[13].mxu0 }
 0x4a9   :  { %v659_v39 = vpop.f32.mrb[14].mxu0 }
 0x4aa   :  { %v830_v40 = vpop.f32.mrb[15].mxu0 }
 0x4ab   :  { %v704_v41 = vpop.f32.mrb[12].mxu1 }
 0x4ac   :  { %711 = vst.msk [vmem:[#allocation10 + $0x8] sm:$0xff] %vm186_vm0, %v704_v41  ;;  %v835_v13 = vpop.f32.mrb[13].mxu1 }
 0x4ad   :  { %v707_v42 = vpop.f32.mrb[14].mxu1 }
 0x4ae   :  { %983 = shalt.err (!%p980_p8)
}
 0x4af   :  { %s984_s30 = scalar_lea.hbm %s1220_s6, 256 }
 0x4b0   :  { %p985_p9 = scmp.ne.s32.totalorder %s1220_s6, %s984_s30  ;;  %p988_p10 = scmp.lt.u32.totalorder %s984_s30, %s1220_s6 }
 0x4b2   :  { %p990_p11 = pnand %p988_p10, %p985_p9 }
 0x4b4   :  { %993 = shalt.err (!%p990_p11)
}
 0x4b5   :  { %723 = dma.vmem_to_hbm [thread:$0]  %s718_s26, 256, %s1220_s6, [#allocation4], %s1004_s9, %s1004_s9, %s1005_s10   ;;  %v836_v43 = vpop.f32.mrb[15].mxu1 }
 0x4b6   :  { %1000 = dma.done.wait [#allocation4], 256  }
 0x4b7   :  { %1001 = vsyncadd [#allocation4], 4294967040 }
 0x4b8   :  { %727 = vsyncpa [#allocation3], 1 }
 0x4b9   :  { %728 = vsyncpa [#allocation6], 1 }
 0x4ba   :  { %729 = vsyncpa [#allocation9], 1 }
 0x4bb   :  { %730 = vsyncpa [#allocation4], 1 }

</bundles_post_ra>
